<compile_context>
chip_gen: v7x
topology: tpu7x:2x2x1
jax: 0.10.0
libtpu: 0.0.40
codegen_flags: <defaults>
</compile_context>

<pallas_src>
import functools

import jax
import jax.numpy as jnp
from jax.experimental import pallas as pl
from jax.experimental.pallas import tpu as pltpu


def _round_up(a: int, b: int) -> int:
    return ((a + b - 1) // b) * b


def _sublane_multiple(dtype) -> int:
    nbytes = jnp.dtype(dtype).itemsize
    if nbytes >= 4:
        return 8
    if nbytes == 2:
        return 16
    return 32


@functools.lru_cache(maxsize=None)
def _vmem_budget_bytes() -> int:
    """Per-generation VMEM budget with headroom for Mosaic internal scratch."""
    mib = 1024 * 1024
    vmem = 64 * mib  # conservative default (v7x-sized) if query fails
    try:
        info = pltpu.get_tpu_info()
        vmem = int(getattr(info, "vmem_capacity_bytes", vmem)) or vmem
    except Exception:
        pass
    if vmem >= 128 * mib:
        return 100 * mib  # v5e / v6e: big tiles + full weight residency
    # v7x (64 MiB physical): leave headroom, never request the whole thing.
    return max(24 * mib, min(vmem - 12 * mib, int(vmem * 0.80)))


@functools.lru_cache(maxsize=None)
def _num_tensorcores_hint() -> int:
    """Cheap hint: v7x has 2 TensorCores per chip; older gens have 1."""
    try:
        kind = (getattr(jax.devices()[0], "device_kind", "") or "").lower()
        if "v7" in kind:
            return 2
    except Exception:
        pass
    return 1


# --------------------------------------------------------------------------- #
# Kernel
# --------------------------------------------------------------------------- #
def _plm_mlp_kernel(x_ref, w_up_ref, w_down_ref, o_ref, *scratch):
    # x_ref:      (tm, hidden)      activation tile
    # w_up_ref:   (hidden, tn)      slab of pre-transposed up_proj weight
    # w_down_ref: (tn, hidden)      slab of pre-transposed down_proj weight
    # o_ref:      (tm, hidden)      resident across the reduction (j) axis
    # scratch:    () in single-step mode, or (acc_ref,) f32 accumulator
    compute_dtype = w_up_ref.dtype

    # Explicit cast so an f32 input still runs the matmul at the weight
    # (e.g. bf16) MXU rate; accumulation stays f32 via preferred_element_type.
    x = x_ref[...].astype(compute_dtype)

    # up_proj slab on the MXU.
    h = jnp.dot(x, w_up_ref[...], preferred_element_type=jnp.float32)

    # relu^2 ("relu2") on the VPU, in f32.
    h = jnp.maximum(h, 0.0)
    h = h * h

    # down_proj slab on the MXU.
    partial = jnp.dot(h.astype(compute_dtype), w_down_ref[...],
                      preferred_element_type=jnp.float32)

    if not scratch:
        # Single reduction step (weight-resident / full-intermediate tile):
        # write the output tile directly, no accumulator round-trip.
        o_ref[...] = partial.astype(o_ref.dtype)
        return

    acc_ref, = scratch
    j = pl.program_id(1)

    @pl.when(j == 0)
    def _():
        # Store first partial product directly (saves a zero-fill + RMW).
        acc_ref[...] = partial

    @pl.when(j != 0)
    def _():
        acc_ref[...] += partial

    @pl.when(j == pl.num_programs(1) - 1)
    def _():
        o_ref[...] = acc_ref[...].astype(o_ref.dtype)


# --------------------------------------------------------------------------- #
# Static tile planning (shape/dtype driven; no tracers)
# --------------------------------------------------------------------------- #
def _plan(seq, hidden, intermediate, x_dtype, w_dtype, tm_req, tn_req):
    sub = _sublane_multiple(x_dtype)
    budget = _vmem_budget_bytes()
    x_b = jnp.dtype(x_dtype).itemsize
    w_b = jnp.dtype(w_dtype).itemsize

    # Seq tile: weight-streaming arithmetic intensity ~ 2*tm FLOP/weight-byte,
    # so tm=512 keeps v6e (and v5e/v7x) compute-bound; sublane-packed rounding.
    tm = max(sub, min(int(tm_req), _round_up(seq, sub)))
    tm = (tm // sub) * sub

    def act_bytes(tm_, with_acc):
        b = 2 * tm_ * hidden * x_b       # x tile, double buffered
        b += 2 * tm_ * hidden * x_b      # out tile, double buffered
        if with_acc:
            b += tm_ * hidden * 4        # f32 accumulator scratch
        return b

    # Keep activation tiles well inside the budget (huge-hidden safety).
    while tm > sub and act_bytes(tm, True) > budget // 2:
        tm = max(sub, ((tm // 2) // sub) * sub)

    # On multi-TensorCore parts (v7x) make sure the "parallel" seq axis has at
    # least two tiles so both cores get work.
    if _num_tensorcores_hint() > 1 and seq > sub:
        while _round_up(seq, tm) // tm < 2 and tm > sub:
            tm = max(sub, ((tm // 2) // sub) * sub)

    w_full = 2 * hidden * intermediate * w_b  # up + down weights, one copy

    if tn_req is None:
        # Weight-resident mode: whole weights live in VMEM, streamed from HBM
        # exactly once (single reduction step -> no accumulator). Use a single
        # weight buffer (pl.Buffered(1)) only when that is what fits.
        for nbuf in (2, 1):
            if nbuf * w_full + act_bytes(tm, False) <= budget:
                return dict(tm=tm, tn=intermediate, weight_buffers=nbuf)

        # Streaming mode: largest 128-aligned divisor of `intermediate` whose
        # double-buffered slabs fit (divisor => no weight padding emitted).
        cands = [c for c in (4096, 2048, 1024, 512, 256, 128)
                 if c < intermediate and intermediate % c == 0]
        if not cands:
            cands = [intermediate]
        for c in cands:
            if 4 * hidden * c * w_b + act_bytes(tm, True) <= budget:
                return dict(tm=tm, tn=c, weight_buffers=2)
        return dict(tm=tm, tn=cands[-1], weight_buffers=2)  # best effort

    # Explicit intermediate-tile override.
    tn = min(int(tn_req), intermediate)
    if tn < intermediate:
        tn = max(128, (tn // 128) * 128)
    return dict(tm=tm, tn=tn, weight_buffers=2)


# --------------------------------------------------------------------------- #
# pallas_call wrapper
# --------------------------------------------------------------------------- #
@functools.partial(jax.jit, static_argnames=("tm", "tn", "weight_buffers"))
def _plm_mlp_call(x, w_up_t, w_down_t, *, tm, tn, weight_buffers):
    seq, hidden = x.shape
    intermediate = w_up_t.shape[1]
    out_dtype = x.dtype

    # Zero-padding is exact: padded seq rows are discarded, and padded
    # intermediate columns/rows contribute relu2(0) = 0 to the second matmul.
    seq_p = _round_up(seq, tm)
    if seq_p != seq:
        x = jnp.pad(x, ((0, seq_p - seq), (0, 0)))

    inter_p = _round_up(intermediate, tn)
    if inter_p != intermediate:
        # Only reachable with an explicit non-divisor `tn`; the auto planner
        # always picks divisor tiles so no weight pad is emitted per call.
        w_up_t = jnp.pad(w_up_t, ((0, 0), (0, inter_p - intermediate)))
        w_down_t = jnp.pad(w_down_t, ((0, inter_p - intermediate), (0, 0)))

    grid = (seq_p // tm, inter_p // tn)
    multi_step = grid[1] > 1

    if weight_buffers == 1:
        # Resident single-buffered weights: constant block index across the
        # whole grid, fetched from HBM exactly once.
        w_up_spec = pl.BlockSpec((hidden, tn), lambda i, j: (0, j),
                                 pipeline_mode=pl.Buffered(1))
        w_down_spec = pl.BlockSpec((tn, hidden), lambda i, j: (j, 0),
                                   pipeline_mode=pl.Buffered(1))
    else:
        w_up_spec = pl.BlockSpec((hidden, tn), lambda i, j: (0, j))
        w_down_spec = pl.BlockSpec((tn, hidden), lambda i, j: (j, 0))

    w_bytes = (w_up_t.size + w_down_t.size) * jnp.dtype(w_up_t.dtype).itemsize
    act_itemsize = jnp.dtype(out_dtype).itemsize
    cost = pl.CostEstimate(
        flops=4 * seq_p * hidden * inter_p,
        transcendentals=0,
        bytes_accessed=2 * seq_p * hidden * act_itemsize + w_bytes,
    )

    out = pl.pallas_call(
        _plm_mlp_kernel,
        out_shape=jax.ShapeDtypeStruct((seq_p, hidden), out_dtype),
        grid_spec=pltpu.PrefetchScalarGridSpec(
            num_scalar_prefetch=0,
            grid=grid,
            in_specs=[
                pl.BlockSpec((tm, hidden), lambda i, j: (i, 0)),
                w_up_spec,
                w_down_spec,
            ],
            # Output tile constant across j -> resident, written once.
            out_specs=pl.BlockSpec((tm, hidden), lambda i, j: (i, 0)),
            scratch_shapes=(
                [pltpu.VMEM((tm, hidden), jnp.float32)] if multi_step else []),
        ),
        compiler_params=pltpu.CompilerParams(
            dimension_semantics=("parallel", "arbitrary"),
            vmem_limit_bytes=_vmem_budget_bytes(),
        ),
        cost_estimate=cost,
    )(x, w_up_t, w_down_t)

    if seq_p != seq:
        out = out[:seq]
    return out


# --------------------------------------------------------------------------- #
# Public API
# --------------------------------------------------------------------------- #
def prepare_plm_mlp_weights(w_up, w_down, compute_dtype=None):
    """One-time (weight-load time) prep: transpose nn.Linear weights to
    [in, out] layout and optionally cast to the compute dtype (e.g. bf16 for
    full MXU rate). Keep the results and reuse them across forward calls so
    no transpose/cast HBM traffic lands on the per-call path.

    w_up:   [intermediate, hidden]   (PyTorch nn.Linear layout, bias=False)
    w_down: [hidden, intermediate]
    """
    w_up_t = jnp.asarray(w_up).T       # (hidden, intermediate)
    w_down_t = jnp.asarray(w_down).T   # (intermediate, hidden)
    if compute_dtype is not None:
        w_up_t = w_up_t.astype(compute_dtype)
        w_down_t = w_down_t.astype(compute_dtype)
    return w_up_t, w_down_t


def plm_mlp(x, w_up_t, w_down_t, *, tm: int = 512, tn=None):
    """PLMMLP forward: down_proj(relu2(up_proj(x))).

    x:        [..., hidden]          (any leading dims, flattened to seq)
    w_up_t:   [hidden, intermediate] (from prepare_plm_mlp_weights)
    w_down_t: [intermediate, hidden]
    tm: requested seq tile (auto-clipped/rounded).
    tn: intermediate tile; None = auto (full weight residency when VMEM
        allows, else the largest fitting 128-aligned divisor of intermediate).
    Returns x.dtype output with x's shape.
    """
    orig_shape = x.shape
    hidden = orig_shape[-1]
    h2, intermediate = w_up_t.shape
    if h2 != hidden or w_down_t.shape != (intermediate, hidden):
        raise ValueError("weight shapes inconsistent with input hidden size")

    x2d = x.reshape(-1, hidden)
    plan = _plan(x2d.shape[0], hidden, intermediate,
                 x2d.dtype, w_up_t.dtype, tm, tn)
    out = _plm_mlp_call(x2d, w_up_t, w_down_t, **plan)
    return out.reshape(orig_shape)


def plm_mlp_reference(x, w_up, w_down):
    """Pure-JAX reference, PyTorch weight layout, f32 math."""
    h = x.astype(jnp.float32) @ w_up.T.astype(jnp.float32)
    h = jnp.maximum(h, 0.0) ** 2
    return (h @ w_down.T.astype(jnp.float32)).astype(x.dtype)


# --------------------------------------------------------------------------- #
# Tests
# --------------------------------------------------------------------------- #
if __name__ == "__main__":
    key = jax.random.PRNGKey(0)

    # Test 1: small 3-D input (batch=2, seq=8, hidden=32, intermediate=64),
    # weight-resident single-step path, f32.
    b1, s1, h1, i1 = 2, 8, 32, 64
    kx, ku, kd, key = jax.random.split(key, 4)
    x1 = jax.random.normal(kx, (b1, s1, h1), dtype=jnp.float32)
    w_up1 = jax.random.normal(ku, (i1, h1), dtype=jnp.float32) * 0.05
    w_dn1 = jax.random.normal(kd, (h1, i1), dtype=jnp.float32) * 0.05
    w_up_t1, w_dn_t1 = prepare_plm_mlp_weights(w_up1, w_dn1)
    out1 = jax.block_until_ready(plm_mlp(x1, w_up_t1, w_dn_t1))
    ref1 = plm_mlp_reference(x1, w_up1, w_dn1)
    assert out1.shape == (b1, s1, h1)
    assert jnp.allclose(out1, ref1, atol=1e-4, rtol=1e-4), "mismatch (test 1)"

    # Test 2: seq padding + multi-step reduction (accumulator path) via
    # explicit tiles: seq=40 -> pad to 48 with tm=16; tn=128 -> 2 j-steps.
    s2, h2, i2 = 40, 32, 256
    kx, ku, kd, key = jax.random.split(key, 4)
    x2 = jax.random.normal(kx, (s2, h2), dtype=jnp.float32)
    w_up2 = jax.random.normal(ku, (i2, h2), dtype=jnp.float32) * 0.05
    w_dn2 = jax.random.normal(kd, (h2, i2), dtype=jnp.float32) * 0.05
    w_up_t2, w_dn_t2 = prepare_plm_mlp_weights(w_up2, w_dn2)
    out2 = jax.block_until_ready(plm_mlp(x2, w_up_t2, w_dn_t2, tm=16, tn=128))
    ref2 = plm_mlp_reference(x2, w_up2, w_dn2)
    assert out2.shape == (s2, h2)
    assert jnp.allclose(out2, ref2, atol=1e-4, rtol=1e-4), "mismatch (test 2)"

    # Test 3: bf16 compute dtype (weights cast once at prep; f32 x is cast to
    # bf16 in-kernel before the MXU matmuls). Looser tolerance for bf16.
    s3, h3, i3 = 24, 64, 128
    kx, ku, kd, key = jax.random.split(key, 4)
    x3 = jax.random.normal(kx, (s3, h3), dtype=jnp.float32)
    w_up3 = jax.random.normal(ku, (i3, h3), dtype=jnp.float32) * 0.05
    w_dn3 = jax.random.normal(kd, (h3, i3), dtype=jnp.float32) * 0.05
    w_up_t3, w_dn_t3 = prepare_plm_mlp_weights(w_up3, w_dn3,
                                               compute_dtype=jnp.bfloat16)
    out3 = jax.block_until_ready(plm_mlp(x3, w_up_t3, w_dn_t3))
    ref3 = plm_mlp_reference(x3, w_up3, w_dn3)
    assert out3.shape == (s3, h3)
    assert jnp.allclose(out3, ref3, atol=5e-2, rtol=5e-2), "mismatch (test 3)"

    print("KERNEL_OK")
</pallas_src>

<mosaic_0001>
module attributes {stable_mosaic.version = 11 : i64} {
  func.func @_plm_mlp_kernel(%arg0: i32, %arg1: i32, %arg2: memref<16x32xf32, #tpu.memory_space<vmem>>, %arg3: memref<32x64xf32, #tpu.memory_space<vmem>>, %arg4: memref<64x32xf32, #tpu.memory_space<vmem>>, %arg5: memref<16x32xf32, #tpu.memory_space<vmem>>) attributes {dimension_semantics = [#tpu.dimension_semantics<parallel>, #tpu.dimension_semantics<arbitrary>], iteration_bounds = array<i64: 1, 1>, scalar_prefetch = 0 : i64, scratch_operands = 0 : i64, tpu.core_type = #tpu.core_type<tc>, window_params = [{transform_indices = @transform_0, window_bounds = array<i64: 16, 32>}, {transform_indices = @transform_1, window_bounds = array<i64: 32, 64>}, {transform_indices = @transform_2, window_bounds = array<i64: 64, 32>}, {transform_indices = @transform_3, window_bounds = array<i64: 16, 32>}]} {
    %c0 = arith.constant 0 : index
    %c0_0 = arith.constant 0 : index
    %0 = vector.load %arg2[%c0, %c0_0] : memref<16x32xf32, #tpu.memory_space<vmem>>, vector<16x32xf32>
    %c0_1 = arith.constant 0 : index
    %c0_2 = arith.constant 0 : index
    %1 = vector.load %arg3[%c0_1, %c0_2] : memref<32x64xf32, #tpu.memory_space<vmem>>, vector<32x64xf32>
    %cst = arith.constant dense<0.000000e+00> : vector<16x64xf32>
    %2 = tpu.matmul %0, %1, %cst {dimension_numbers = #tpu.dot_dimension_numbers<[1], [0], [0], [1], [0, 0, 1, 1], [], []>} : vector<16x32xf32>, vector<32x64xf32>, vector<16x64xf32> -> vector<16x64xf32>
    %cst_3 = arith.constant 0.000000e+00 : f32
    %3 = vector.broadcast %cst_3 : f32 to vector<16x64xf32>
    %4 = arith.maximumf %2, %3 : vector<16x64xf32>
    %5 = arith.mulf %4, %4 : vector<16x64xf32>
    %c0_4 = arith.constant 0 : index
    %c0_5 = arith.constant 0 : index
    %6 = vector.load %arg4[%c0_4, %c0_5] : memref<64x32xf32, #tpu.memory_space<vmem>>, vector<64x32xf32>
    %cst_6 = arith.constant dense<0.000000e+00> : vector<16x32xf32>
    %7 = tpu.matmul %5, %6, %cst_6 {dimension_numbers = #tpu.dot_dimension_numbers<[1], [0], [0], [1], [0, 0, 1, 1], [], []>} : vector<16x64xf32>, vector<64x32xf32>, vector<16x32xf32> -> vector<16x32xf32>
    %c0_7 = arith.constant 0 : index
    %c0_8 = arith.constant 0 : index
    %8 = vector.load %arg5[%c0_7, %c0_8] : memref<16x32xf32, #tpu.memory_space<vmem>>, vector<16x32xf32>
    tpu.vector_store %arg5[%c0_7, %c0_8], %7 {strides = array<i32>} : memref<16x32xf32, #tpu.memory_space<vmem>>, vector<16x32xf32>,
    return
  }
  func.func @transform_0(%arg0: i32, %arg1: i32) -> (i32, i32) {
    %c0_i32 = arith.constant 0 : i32
    %c0_i32_0 = arith.constant 0 : i32
    return %arg0, %c0_i32 : i32, i32
  }
  func.func @transform_1(%arg0: i32, %arg1: i32) -> (i32, i32) {
    %c0_i32 = arith.constant 0 : i32
    %c0_i32_0 = arith.constant 0 : i32
    return %c0_i32, %arg1 : i32, i32
  }
  func.func @transform_2(%arg0: i32, %arg1: i32) -> (i32, i32) {
    %c0_i32 = arith.constant 0 : i32
    %c0_i32_0 = arith.constant 0 : i32
    return %arg1, %c0_i32 : i32, i32
  }
  func.func @transform_3(%arg0: i32, %arg1: i32) -> (i32, i32) {
    %c0_i32 = arith.constant 0 : i32
    %c0_i32_0 = arith.constant 0 : i32
    return %arg0, %c0_i32 : i32, i32
  }
}

</mosaic_0001>

<bundles_post_ra>
// kernel: _plm_mlp_call.1
= control target key start
LH: loop header
LB: loop body
LE: loop exit
PB: predicated region body
PF: predicated region fallthrough
CT: control target
= control target key end

     0   :  { %vm21_vm0 = vcmask 261120   ;;  %s397_s0 = inlined_call_operand.vmem [shape: f32[16,32], index: 0, kind: input, shape index: {}]   ;;  %s398_s1 = inlined_call_operand.vmem [shape: f32[32,64], index: 1, kind: input, shape index: {}]   ;;  %s399_s2 = inlined_call_operand.vmem [shape: f32[64,32], index: 2, kind: input, shape index: {}]   ;;  %s400_s3 = inlined_call_operand.hbm [shape: f32[16,32], index: 3, kind: output, shape index: {}]  }
   0x1   :  { %v17_v0 = vld [vmem:[%s398_s1] sm:$0xff]  ;;  %v18_v1 = vld [vmem:[%s398_s1 + $0x8] sm:$0xff]  ;;  %v19_v2 = vld [vmem:[%s398_s1 + $0x10] sm:$0xff] }
   0x2   :  { %v265_v3 = vpack.c.bf16 %v18_v1, %v17_v0  ;;  %v20_v4 = vld [vmem:[%s398_s1 + $0x18] sm:$0xff]  ;;  %v15_v5 = vld [vmem:[%s397_s0] sm:$0xff]  ;;  %v108_v8 = vld [vmem:[%s399_s2 + $0x8] sm:$0xff] }
   0x3   :  { %v269_v6 = vpack.c.bf16 %v20_v4, %v19_v2  ;;  %243 = vmatprep.mubr.msk.f32.mxu0 %vm21_vm0, %v15_v5  ;;  %v107_v7 = vld [vmem:[%s399_s2] sm:$0xff]  ;;  %v109_v9 = vld [vmem:[%s399_s2 + $0x10] sm:$0xff]  ;;  %v110_v11 = vld [vmem:[%s399_s2 + $0x18] sm:$0xff] }
   0x4   :  { %266 = vmatprep.subr.bf16.mxu0 %v265_v3  ;;  %v273_v10 = vpack.c.bf16 %v108_v8, %v107_v7  ;;  %v277_v12 = vpack.c.bf16 %v110_v11, %v109_v9  ;;  %v111_v13 = vld [vmem:[%s399_s2 + $0x20] sm:$0xff]  ;;  %v112_v14 = vld [vmem:[%s399_s2 + $0x28] sm:$0xff] }
   0x5   :  { %268 = vmatpush3.bf16.msra.mxu0 %v265_v3 }
   0x6   :  { %8 = vsyncpa [#allocation3], 0  ;;  %270 = vmatprep.subr.bf16.mxu0 %v269_v6  ;;  %274 = vmatprep.subr.bf16.mxu1 %v273_v10  ;;  %v281_v15 = vpack.c.bf16 %v112_v14, %v111_v13  ;;  %v16_v16 = vld [vmem:[%s397_s0 + $0x8] sm:$0xff]  ;;  %v113_v17 = vld [vmem:[%s399_s2 + $0x30] sm:$0xff]  ;;  %vm115_vm1 = vcmask 523264   ;;  %s316_s0 = smov [#allocation2]  }
   0x7   :  { %276 = vmatpush3.bf16.msra.mxu1 %v273_v10  ;;  %v114_v18 = vld [vmem:[%s399_s2 + $0x38] sm:$0xff]  ;;  %s204_s12 = sshll.u32 %s316_s0, 4  ;;  %s205_s12 = int_to_ptr.vmem [resolvable:$true] %s204_s12 }
   0x8   :  { %278 = vmatprep.subr.bf16.mxu1 %v277_v12  ;;  %v285_v19 = vpack.c.bf16 %v114_v18, %v113_v17  ;;  %s292_s2 = scalar_lea.vmem %s205_s12, 256  ;;  %p297_p1 = scmp.lt.s32.totalorder %s205_s12, %s205_s12 }
   0x9   :  { %272 = vmatpush3.bf16.msra.mxu0 %v269_v6  ;;  %p293_p0 = scmp.ne.s32.totalorder %s205_s12, %s292_s2  ;;  %p298_p2 = scmp.lt.s32.totalorder %s292_s2, %s292_s2 }
   0xb   :  { %280 = vmatpush3.bf16.msra.mxu1 %v277_v12  ;;  %p299_p3 = por %p298_p2, %p297_p1 }
   0xc   :  { %244 = vmatmul.mubr.msk.f32.vlgmr.msra.gmra.mrb[0].mxu0 %vm21_vm0, %v16_v16  ;;  %282 = vmatprep.subr.bf16.mxu1 %v281_v15 }
   0xd   :  { %p300_p4 = pnand %p299_p3, %p293_p0 }
   0xf   :  { %284 = vmatpush3.bf16.msra.mxu1 %v281_v15 }
  0x10   :  { %286 = vmatprep.subr.bf16.mxu1 %v285_v19 }
  0x13   :  { %288 = vmatpush3.bf16.msra.mxu1 %v285_v19 }
  0xdf   :  { %v245_v20 = vpop.f32.mrb[0].mxu0 }
  0xe0   :  { %v104_v21 = vmax.f32 %v245_v20, 0.0  ;;  %v94_v22 = vpop.f32.mrb[1].mxu0 }
  0xe1   :  { %v103_v23 = vmax.f32 %v94_v22, 0.0 }
  0xe2   :  { %v106_v25 = vmul.f32 %v104_v21, %v104_v21 }
  0xe3   :  { %v105_v24 = vmul.f32 %v103_v23, %v103_v23 }
  0xe5   :  { %262 = vmatprep.mubr.msk.f32.mxu1 %vm115_vm1, %v105_v24 }
  0xe6   :  { %263 = vmatmul.mubr.msk.f32.vlgmr.msra.gmra.mrb[0].mxu1 %vm115_vm1, %v106_v25 }
 0x1b9   :  { %v264_v26 = vpop.f32.mrb[0].mxu1 }
 0x1ba   :  { %198 = vst.msk [vmem:[#allocation2 + $0x8] sm:$0xff] %vm21_vm0, %v264_v26  ;;  %v188_v27 = vpop.f32.mrb[1].mxu1 }
 0x1bb   :  { %197 = vst.msk [vmem:[#allocation2] sm:$0xff] %vm21_vm0, %v188_v27 }
 0x1bc   :  { %303 = shalt.err (!%p300_p4)
}
 0x1bd   :  { %s304_s15 = scalar_lea.hbm %s400_s3, 256 }
 0x1be   :  { %p305_p5 = scmp.ne.s32.totalorder %s400_s3, %s304_s15  ;;  %p308_p6 = scmp.lt.u32.totalorder %s304_s15, %s400_s3 }
 0x1c0   :  { %p310_p7 = pnand %p308_p6, %p305_p5 }
 0x1c2   :  { %313 = shalt.err (!%p310_p7)
}
 0x1c3   :  { %s317_s20 = smov 128   ;;  %s318_s21 = smov 8  }
 0x1c4   :  { %210 = dma.vmem_to_hbm [thread:$0]  %s205_s12, 256, %s400_s3, [#allocation3], %s317_s20, %s317_s20, %s318_s21  }
 0x1c5   :  { %314 = dma.done.wait [#allocation3], 256  }
 0x1c6   :  { %315 = vsyncadd [#allocation3], 4294967040 }
 0x1c7   :  { %214 = vsyncpa [#allocation3], 1 }

</bundles_post_ra>
